<compile_context>
chip_gen: v7x
topology: tpu7x:2x2x1
jax: 0.10.0
libtpu: 0.0.40
codegen_flags: <defaults>
</compile_context>

<pallas_src>
import math
import jax
import jax.numpy as jnp
from jax import lax
from jax.experimental import pallas as pl
from jax.experimental.pallas import tpu as pltpu

# ---------------- config (small synthetic shapes) ----------------
MEL   = 16     # mel / noise feature dim
COND  = 16     # cond (cat_mel_text) feature dim
SEQ   = 8      # sequence length
DIM   = 128    # transformer hidden dim == head dim (1 head, lane aligned)
DFF   = 256    # FFN hidden dim
FREQ  = 256    # freq_embed_dim (fixed by the module)
STEPS = 4
CFG_STRENGTH = 2.0
SWAY_COEF    = -1.0
ATTN_SCALE   = 1.0 / math.sqrt(DIM)
HALF    = DIM // 2
NEG_INF = -1e30

_VMEM = pl.BlockSpec(memory_space=pltpu.MemorySpace.VMEM)
_SMEM = pl.BlockSpec(memory_space=pltpu.MemorySpace.SMEM)


# ---------------- shared DiT block (traced inline into both kernels) ----------------
def _dit_block(x, tcond, hcond_ref, cos_ref, sins_ref, mask_ref,
               w_in_mel_ref, wqkv_ref, wo_ref, w1_ref, w2_ref, wout_ref):
    """One CFG-folded DiT block.  x: (SEQ, MEL) f32, tcond: (1, DIM) f32.
    Rows [0,SEQ) of the folded (2*SEQ, .) operands are the conditional branch,
    rows [SEQ,2*SEQ) the cond_drop branch.  Returns the CFG-combined velocity
    prediction, shape (SEQ, MEL) f32."""
    f32, bf16 = jnp.float32, jnp.bfloat16

    # input projection of the (shared) noise rows, duplicated over the CFG fold
    hx = jnp.dot(x.astype(bf16), w_in_mel_ref[...], preferred_element_type=f32)   # (S, D)
    h = jnp.concatenate([hx, hx], axis=0) + hcond_ref[...] + tcond                # (2S, D)

    cos = cos_ref[...]
    sins = sins_ref[...]            # rotate_half sign pre-folded into the table

    def rope(t):
        # rotate_half(x) = [-x2, x1]; sign is folded into `sins`, so this is an
        # XLU lane roll plus two VPU multiply-adds.
        return t * cos + pltpu.roll(t, shift=HALF, axis=1) * sins

    # fused QKV projection: one (2S, D) x (D, 3D) MXU push
    qkv = jnp.dot(h.astype(bf16), wqkv_ref[...], preferred_element_type=f32)      # (2S, 3D)
    q = rope(qkv[:, :DIM])
    k = rope(qkv[:, DIM:2 * DIM])
    v = qkv[:, 2 * DIM:]

    # single attention over the folded CFG batch; block-diagonal mask keeps the
    # two branches independent.  bf16 MXU operands, f32 accumulation.
    s = lax.dot_general(q.astype(bf16), k.astype(bf16), (((1,), (1,)), ((), ())),
                        preferred_element_type=f32) * ATTN_SCALE + mask_ref[...]  # (2S, 2S)
    m = jnp.max(s, axis=-1, keepdims=True)
    p = jnp.exp(s - m)
    p = p * pl.reciprocal(jnp.sum(p, axis=-1, keepdims=True), approx=True)
    o = jnp.dot(p.astype(bf16), v.astype(bf16), preferred_element_type=f32)       # (2S, D)
    h = h + jnp.dot(o.astype(bf16), wo_ref[...], preferred_element_type=f32)

    # GELU FFN
    ff = jax.nn.gelu(jnp.dot(h.astype(bf16), w1_ref[...], preferred_element_type=f32),
                     approximate=True)
    h = h + jnp.dot(ff.astype(bf16), w2_ref[...], preferred_element_type=f32)

    # CFG combine folded through the (linear) output projection:
    #   (1+cfg)*pred0 - cfg*pred1 == ((1+cfg)*h0 - cfg*h1) @ wout
    hc = (1.0 + CFG_STRENGTH) * h[:SEQ] - CFG_STRENGTH * h[SEQ:]
    return jnp.dot(hc.astype(bf16), wout_ref[...], preferred_element_type=f32)    # (S, MEL)


# ---------------- kernels ----------------
def f5_step_kernel(dt_ref, tcond_ref, noise_ref, hcond_ref, cos_ref, sins_ref, mask_ref,
                   w_in_mel_ref, wqkv_ref, wo_ref, w1_ref, w2_ref, wout_ref, out_ref):
    """Single Euler step (matches F5Transformer.forward for a given time_step)."""
    x = noise_ref[...]
    pred = _dit_block(x, tcond_ref[...], hcond_ref, cos_ref, sins_ref, mask_ref,
                      w_in_mel_ref, wqkv_ref, wo_ref, w1_ref, w2_ref, wout_ref)
    out_ref[...] = x + pred * dt_ref[0]


def f5_sample_kernel(dt_tab_ref, tcond_tab_ref, noise_ref, hcond_ref, cos_ref, sins_ref,
                     mask_ref, w_in_mel_ref, wqkv_ref, wo_ref, w1_ref, w2_ref, wout_ref,
                     out_ref):
    """Whole STEPS Euler loop; grid=(STEPS,).  out_ref is the carried state
    (constant output block -> VMEM resident), weights are fetched once."""
    step = pl.program_id(0)

    @pl.when(step == 0)
    def _():
        out_ref[...] = noise_ref[...]

    x = out_ref[...]
    pred = _dit_block(x, tcond_tab_ref[step], hcond_ref, cos_ref, sins_ref, mask_ref,
                      w_in_mel_ref, wqkv_ref, wo_ref, w1_ref, w2_ref, wout_ref)
    out_ref[...] = x + pred * dt_tab_ref[step]


# ---------------- pallas_call wrappers ----------------
def run_f5_step(dt, tcond, noise, hcond, cos2, sins2, mask, weights):
    return pl.pallas_call(
        f5_step_kernel,
        out_shape=jax.ShapeDtypeStruct((SEQ, MEL), jnp.float32),
        in_specs=[_SMEM] + [_VMEM] * (6 + len(weights)),
        out_specs=_VMEM,
    )(dt, tcond, noise, hcond, cos2, sins2, mask, *weights)


def _cost_estimate(weights, arrs):
    two_s = 2 * SEQ
    flops_step = 2 * (SEQ * MEL * DIM + two_s * DIM * 3 * DIM + 2 * two_s * two_s * DIM
                      + two_s * DIM * DIM + 2 * two_s * DIM * DFF + SEQ * DIM * MEL)
    trans_step = two_s * two_s + two_s * DFF + two_s
    nbytes = (sum(int(a.size) * a.dtype.itemsize for a in arrs)
              + sum(int(w.size) * w.dtype.itemsize for w in weights)
              + SEQ * MEL * 4)
    return pl.CostEstimate(flops=STEPS * flops_step,
                           transcendentals=STEPS * trans_step,
                           bytes_accessed=int(nbytes))


def run_f5_sample(dt_table, tcond_table, noise, hcond, cos2, sins2, mask, weights):
    def const(shape):
        return pl.BlockSpec(shape, lambda s: (0,) * len(shape))

    in_specs = ([_SMEM,                          # (STEPS,) delta_t table in SMEM
                 const(tcond_table.shape),       # (STEPS, 1, DIM) t_cond table, resident
                 const(noise.shape), const(hcond.shape),
                 const(cos2.shape), const(sins2.shape), const(mask.shape)]
                + [const(w.shape) for w in weights])
    return pl.pallas_call(
        f5_sample_kernel,
        out_shape=jax.ShapeDtypeStruct((SEQ, MEL), jnp.float32),
        grid=(STEPS,),
        in_specs=in_specs,
        out_specs=const((SEQ, MEL)),
        compiler_params=pltpu.CompilerParams(dimension_semantics=("arbitrary",)),
        cost_estimate=_cost_estimate(weights, (tcond_table, noise, hcond, cos2, sins2, mask)),
    )(dt_table, tcond_table, noise, hcond, cos2, sins2, mask, *weights)


# ---------------- module ----------------
class F5TransformerPallas:
    def __init__(self, cfg, steps, sway_coef, key):
        self.cfg_strength = cfg
        self.steps = steps
        self.sway_sampling_coef = sway_coef
        self.freq_embed_dim = FREQ

        # --- exact sway-sampled time schedule & sinusoidal time embedding ---
        t = jnp.linspace(0.0, 1.0, steps + 1, dtype=jnp.float32)
        time_sway = t + sway_coef * (jnp.cos(jnp.pi * 0.5 * t) - 1.0 + t)
        self.delta_t = jnp.diff(time_sway).astype(jnp.float32)                    # (steps,)
        half_dim = FREQ // 2
        emb_factor = math.log(10000.0) / (half_dim - 1)
        emb_factor = 1000.0 * jnp.exp(jnp.arange(half_dim, dtype=jnp.float32) * -emb_factor)
        emb = time_sway[:steps, None] * emb_factor[None, :]                       # (steps, 128)
        self.time_expand = jnp.concatenate([jnp.sin(emb), jnp.cos(emb)], axis=-1)  # (steps, 256)

        # --- deterministic synthetic transformer weights ---
        din = MEL + COND
        shapes = [
            (din, DIM),      # w_in  (split below into mel/cond parts)
            (FREQ, DIM),     # wt1   (timestep MLP, used only at init)
            (DIM, DIM),      # wt2   (timestep MLP, used only at init)
            (DIM, 3 * DIM),  # wqkv  (fused q/k/v projection)
            (DIM, DIM),      # wo
            (DIM, DFF),      # w1
            (DFF, DIM),      # w2
            (DIM, MEL),      # wout
        ]
        keys = jax.random.split(key, len(shapes))
        w_in, wt1, wt2, wqkv, wo, w1, w2, wout = [
            0.05 * jax.random.normal(k, s, jnp.float32) for k, s in zip(keys, shapes)
        ]

        # hoisted batch-invariant timestep MLP: Linear(256,D) -> SiLU -> Linear(D,D)
        th = jnp.dot(self.time_expand, wt1)
        th = th * jax.nn.sigmoid(th)
        t_cond = jnp.dot(th, wt2)                                     # (steps, DIM) f32
        self.t_cond = t_cond
        self.tcond_table = t_cond.reshape(steps, 1, DIM)              # for fused sampler

        # split input projection: cond part is step-invariant -> precomputed per call
        bf16 = jnp.bfloat16
        self.w_in_mel = w_in[:MEL].astype(bf16)
        self.w_in_cond = w_in[MEL:].astype(bf16)
        self.weights = [self.w_in_mel, wqkv.astype(bf16), wo.astype(bf16),
                        w1.astype(bf16), w2.astype(bf16), wout.astype(bf16)]

        # rotate_half sign (folded into sin table) + block-diagonal CFG attention mask
        self.sign = jnp.where(jnp.arange(DIM) < HALF, -1.0, 1.0).astype(jnp.float32)
        r = jnp.arange(2 * SEQ)
        self.mask = jnp.where((r[:, None] < SEQ) == (r[None, :] < SEQ),
                              0.0, NEG_INF).astype(jnp.float32)

    def _prep(self, rope_cos, rope_sin, cat_mel_text, cat_mel_text_drop):
        # step-invariant conditioning: one small XLA matmul per sampling run
        cond2 = jnp.concatenate([cat_mel_text[0], cat_mel_text_drop[0]], axis=0)  # (2S, COND)
        hcond = jnp.dot(cond2.astype(jnp.bfloat16), self.w_in_cond,
                        preferred_element_type=jnp.float32)                       # (2S, D)
        sin_signed = rope_sin[0] * self.sign[None, :]
        cos2 = jnp.concatenate([rope_cos[0], rope_cos[0]], axis=0)                # (2S, D)
        sins2 = jnp.concatenate([sin_signed, sin_signed], axis=0)                 # (2S, D)
        return hcond, cos2, sins2

    def __call__(self, noise, rope_cos, rope_sin, cat_mel_text, cat_mel_text_drop,
                 qk_rotated_empty, time_step):
        # qk_rotated_empty is a zero scratch buffer in the ONNX export; adding it
        # is a no-op, so it is accepted for interface parity and ignored.
        del qk_rotated_empty
        hcond, cos2, sins2 = self._prep(rope_cos, rope_sin, cat_mel_text, cat_mel_text_drop)
        tcond = jnp.take(self.t_cond, time_step, axis=0)[None, :]                 # (1, D)
        dt = jnp.take(self.delta_t, time_step).reshape(1).astype(jnp.float32)     # (1,) SMEM
        out = run_f5_step(dt, tcond, noise[0], hcond, cos2, sins2, self.mask, self.weights)
        return out[None]                                                          # (1, S, MEL)

    def sample(self, noise, rope_cos, rope_sin, cat_mel_text, cat_mel_text_drop):
        # full Euler sampling loop fused into one pallas_call (grid over STEPS)
        hcond, cos2, sins2 = self._prep(rope_cos, rope_sin, cat_mel_text, cat_mel_text_drop)
        out = run_f5_sample(self.delta_t, self.tcond_table, noise[0], hcond, cos2, sins2,
                            self.mask, self.weights)
        return out[None]


# ---------------- main ----------------
if __name__ == "__main__":
    key = jax.random.PRNGKey(0)
    k_noise, k_mel, k_drop, k_w = jax.random.split(key, 4)

    noise = jax.random.normal(k_noise, (1, SEQ, MEL), jnp.float32)
    cat_mel_text = jax.random.normal(k_mel, (1, SEQ, COND), jnp.float32)
    cat_mel_text_drop = jax.random.normal(k_drop, (1, SEQ, COND), jnp.float32)

    # RoPE tables (head_dim = DIM), duplicated-half convention
    pos = jnp.arange(SEQ, dtype=jnp.float32)[:, None]
    inv_freq = 1.0 / (10000.0 ** (jnp.arange(0, DIM, 2, dtype=jnp.float32) / DIM))
    ang = pos * inv_freq[None, :]                       # (S, D/2)
    ang = jnp.concatenate([ang, ang], axis=-1)          # (S, D)
    rope_cos = jnp.cos(ang)[None]                       # (1, S, D)
    rope_sin = jnp.sin(ang)[None]                       # (1, S, D)

    qk_rotated_empty = jnp.zeros((2, SEQ, DIM), jnp.float32)
    time_step = jnp.array(1, dtype=jnp.int32)

    model = F5TransformerPallas(cfg=CFG_STRENGTH, steps=STEPS,
                                sway_coef=SWAY_COEF, key=k_w)

    # 1) single step — matches the PyTorch F5Transformer.forward semantics
    out = model(noise, rope_cos, rope_sin, cat_mel_text, cat_mel_text_drop,
                qk_rotated_empty, time_step)
    jax.block_until_ready(out)
    assert out.shape == (1, SEQ, MEL) and out.dtype == jnp.float32

    # 2) fused STEPS sampler vs. sequential single-step calls (same arithmetic)
    x = noise
    for s in range(STEPS):
        x = model(x, rope_cos, rope_sin, cat_mel_text, cat_mel_text_drop,
                  qk_rotated_empty, jnp.array(s, dtype=jnp.int32))
    x_fused = model.sample(noise, rope_cos, rope_sin, cat_mel_text, cat_mel_text_drop)
    jax.block_until_ready((x, x_fused))
    assert x_fused.shape == (1, SEQ, MEL) and x_fused.dtype == jnp.float32
    assert jnp.allclose(x, x_fused, atol=1e-2, rtol=1e-2), float(jnp.max(jnp.abs(x - x_fused)))

    print("KERNEL_OK")
</pallas_src>

<mosaic_0001>
module attributes {stable_mosaic.version = 11 : i64} {
  func.func @f5_step_kernel(%arg0: memref<1xf32, #tpu.memory_space<smem>>, %arg1: memref<1x128xf32, #tpu.memory_space<vmem>>, %arg2: memref<8x16xf32, #tpu.memory_space<vmem>>, %arg3: memref<16x128xf32, #tpu.memory_space<vmem>>, %arg4: memref<16x128xf32, #tpu.memory_space<vmem>>, %arg5: memref<16x128xf32, #tpu.memory_space<vmem>>, %arg6: memref<16x16xf32, #tpu.memory_space<vmem>>, %arg7: memref<16x128xbf16, #tpu.memory_space<vmem>>, %arg8: memref<128x384xbf16, #tpu.memory_space<vmem>>, %arg9: memref<128x128xbf16, #tpu.memory_space<vmem>>, %arg10: memref<128x256xbf16, #tpu.memory_space<vmem>>, %arg11: memref<256x128xbf16, #tpu.memory_space<vmem>>, %arg12: memref<128x16xbf16, #tpu.memory_space<vmem>>, %arg13: memref<8x16xf32, #tpu.memory_space<vmem>>) attributes {dimension_semantics = [], scalar_prefetch = 0 : i64, scratch_operands = 0 : i64, tpu.core_type = #tpu.core_type<tc>} {
    %c0 = arith.constant 0 : index
    %c0_0 = arith.constant 0 : index
    %0 = vector.load %arg2[%c0, %c0_0] : memref<8x16xf32, #tpu.memory_space<vmem>>, vector<8x16xf32>
    %c0_1 = arith.constant 0 : index
    %c0_2 = arith.constant 0 : index
    %1 = vector.load %arg1[%c0_1, %c0_2] : memref<1x128xf32, #tpu.memory_space<vmem>>, vector<1x128xf32>
    %2 = arith.truncf %0 : vector<8x16xf32> to vector<8x16xbf16>
    %c0_3 = arith.constant 0 : index
    %c0_4 = arith.constant 0 : index
    %3 = vector.load %arg7[%c0_3, %c0_4] : memref<16x128xbf16, #tpu.memory_space<vmem>>, vector<16x128xbf16>
    %cst = arith.constant dense<0.000000e+00> : vector<8x128xf32>
    %4 = tpu.matmul %2, %3, %cst {dimension_numbers = #tpu.dot_dimension_numbers<[1], [0], [0], [1], [0, 0, 1, 1], [], []>} : vector<8x16xbf16>, vector<16x128xbf16>, vector<8x128xf32> -> vector<8x128xf32>
    %5 = tpu.concatenate %4, %4 in 0 : vector<8x128xf32>, vector<8x128xf32> -> vector<16x128xf32>
    %c0_5 = arith.constant 0 : index
    %c0_6 = arith.constant 0 : index
    %6 = vector.load %arg3[%c0_5, %c0_6] : memref<16x128xf32, #tpu.memory_space<vmem>>, vector<16x128xf32>
    %7 = arith.addf %5, %6 : vector<16x128xf32>
    %8 = vector.broadcast %1 : vector<1x128xf32> to vector<16x128xf32>
    %9 = arith.addf %7, %8 : vector<16x128xf32>
    %c0_7 = arith.constant 0 : index
    %c0_8 = arith.constant 0 : index
    %10 = vector.load %arg4[%c0_7, %c0_8] : memref<16x128xf32, #tpu.memory_space<vmem>>, vector<16x128xf32>
    %c0_9 = arith.constant 0 : index
    %c0_10 = arith.constant 0 : index
    %11 = vector.load %arg5[%c0_9, %c0_10] : memref<16x128xf32, #tpu.memory_space<vmem>>, vector<16x128xf32>
    %12 = arith.truncf %9 : vector<16x128xf32> to vector<16x128xbf16>
    %c0_11 = arith.constant 0 : index
    %c0_12 = arith.constant 0 : index
    %13 = vector.load %arg8[%c0_11, %c0_12] : memref<128x384xbf16, #tpu.memory_space<vmem>>, vector<128x384xbf16>
    %cst_13 = arith.constant dense<0.000000e+00> : vector<16x384xf32>
    %14 = tpu.matmul %12, %13, %cst_13 {dimension_numbers = #tpu.dot_dimension_numbers<[1], [0], [0], [1], [0, 0, 1, 1], [], []>} : vector<16x128xbf16>, vector<128x384xbf16>, vector<16x384xf32> -> vector<16x384xf32>
    %15 = vector.extract_strided_slice %14 {offsets = [0, 0], sizes = [16, 128], strides = [1, 1]} : vector<16x384xf32> to vector<16x128xf32>
    %16 = arith.mulf %15, %10 : vector<16x128xf32>
    %c64_i32 = arith.constant 64 : i32
    %17 = tpu.dynamic_rotate %15 by %c64_i32 dim 1 : vector<16x128xf32>, i32 -> vector<16x128xf32>
    %18 = arith.mulf %17, %11 : vector<16x128xf32>
    %19 = arith.addf %16, %18 : vector<16x128xf32>
    %20 = vector.extract_strided_slice %14 {offsets = [0, 128], sizes = [16, 128], strides = [1, 1]} : vector<16x384xf32> to vector<16x128xf32>
    %21 = arith.mulf %20, %10 : vector<16x128xf32>
    %c64_i32_14 = arith.constant 64 : i32
    %22 = tpu.dynamic_rotate %20 by %c64_i32_14 dim 1 : vector<16x128xf32>, i32 -> vector<16x128xf32>
    %23 = arith.mulf %22, %11 : vector<16x128xf32>
    %24 = arith.addf %21, %23 : vector<16x128xf32>
    %25 = vector.extract_strided_slice %14 {offsets = [0, 256], sizes = [16, 128], strides = [1, 1]} : vector<16x384xf32> to vector<16x128xf32>
    %26 = arith.truncf %19 : vector<16x128xf32> to vector<16x128xbf16>
    %27 = arith.truncf %24 : vector<16x128xf32> to vector<16x128xbf16>
    %cst_15 = arith.constant dense<0.000000e+00> : vector<16x16xf32>
    %28 = tpu.matmul %26, %27, %cst_15 {dimension_numbers = #tpu.dot_dimension_numbers<[1], [1], [0], [0], [0, 0, 1, 0], [], []>} : vector<16x128xbf16>, vector<16x128xbf16>, vector<16x16xf32> -> vector<16x16xf32>
    %cst_16 = arith.constant 0.0883883461 : f32
    %29 = vector.broadcast %cst_16 : f32 to vector<16x16xf32>
    %30 = arith.mulf %28, %29 : vector<16x16xf32>
    %c0_17 = arith.constant 0 : index
    %c0_18 = arith.constant 0 : index
    %31 = vector.load %arg6[%c0_17, %c0_18] : memref<16x16xf32, #tpu.memory_space<vmem>>, vector<16x16xf32>
    %32 = arith.addf %30, %31 : vector<16x16xf32>
    %cst_19 = arith.constant dense<0xFF800000> : vector<16xf32>
    %33 = vector.multi_reduction <maximumf>, %32, %cst_19 [1] : vector<16x16xf32> to vector<16xf32>
    %34 = vector.shape_cast %33 : vector<16xf32> to vector<16x1xf32>
    %35 = vector.broadcast %34 : vector<16x1xf32> to vector<16x16xf32>
    %36 = arith.subf %32, %35 : vector<16x16xf32>
    %37 = math.exp %36 : vector<16x16xf32>
    %cst_20 = arith.constant dense<0.000000e+00> : vector<16xf32>
    %38 = vector.multi_reduction <add>, %37, %cst_20 [1] : vector<16x16xf32> to vector<16xf32>
    %39 = vector.shape_cast %38 : vector<16xf32> to vector<16x1xf32>
    %40 = tpu.reciprocal %39 {approx = true} : vector<16x1xf32> -> vector<16x1xf32>
    %41 = vector.broadcast %40 : vector<16x1xf32> to vector<16x16xf32>
    %42 = arith.mulf %37, %41 : vector<16x16xf32>
    %43 = arith.truncf %42 : vector<16x16xf32> to vector<16x16xbf16>
    %44 = arith.truncf %25 : vector<16x128xf32> to vector<16x128xbf16>
    %cst_21 = arith.constant dense<0.000000e+00> : vector<16x128xf32>
    %45 = tpu.matmul %43, %44, %cst_21 {dimension_numbers = #tpu.dot_dimension_numbers<[1], [0], [0], [1], [0, 0, 1, 1], [], []>} : vector<16x16xbf16>, vector<16x128xbf16>, vector<16x128xf32> -> vector<16x128xf32>
    %46 = arith.truncf %45 : vector<16x128xf32> to vector<16x128xbf16>
    %c0_22 = arith.constant 0 : index
    %c0_23 = arith.constant 0 : index
    %47 = vector.load %arg9[%c0_22, %c0_23] : memref<128x128xbf16, #tpu.memory_space<vmem>>, vector<128x128xbf16>
    %cst_24 = arith.constant dense<0.000000e+00> : vector<16x128xf32>
    %48 = tpu.matmul %46, %47, %cst_24 {dimension_numbers = #tpu.dot_dimension_numbers<[1], [0], [0], [1], [0, 0, 1, 1], [], []>} : vector<16x128xbf16>, vector<128x128xbf16>, vector<16x128xf32> -> vector<16x128xf32>
    %49 = arith.addf %9, %48 : vector<16x128xf32>
    %50 = arith.truncf %49 : vector<16x128xf32> to vector<16x128xbf16>
    %c0_25 = arith.constant 0 : index
    %c0_26 = arith.constant 0 : index
    %51 = vector.load %arg10[%c0_25, %c0_26] : memref<128x256xbf16, #tpu.memory_space<vmem>>, vector<128x256xbf16>
    %cst_27 = arith.constant dense<0.000000e+00> : vector<16x256xf32>
    %52 = tpu.matmul %50, %51, %cst_27 {dimension_numbers = #tpu.dot_dimension_numbers<[1], [0], [0], [1], [0, 0, 1, 1], [], []>} : vector<16x128xbf16>, vector<128x256xbf16>, vector<16x256xf32> -> vector<16x256xf32>
    %53 = arith.mulf %52, %52 : vector<16x256xf32>
    %54 = arith.mulf %52, %53 : vector<16x256xf32>
    %cst_28 = arith.constant 4.471500e-02 : f32
    %55 = vector.broadcast %cst_28 : f32 to vector<16x256xf32>
    %56 = arith.mulf %55, %54 : vector<16x256xf32>
    %57 = arith.addf %52, %56 : vector<16x256xf32>
    %cst_29 = arith.constant 0.797884583 : f32
    %58 = vector.broadcast %cst_29 : f32 to vector<16x256xf32>
    %59 = arith.mulf %58, %57 : vector<16x256xf32>
    %60 = math.tanh %59 : vector<16x256xf32>
    %cst_30 = arith.constant 1.000000e+00 : f32
    %61 = vector.broadcast %cst_30 : f32 to vector<16x256xf32>
    %62 = arith.addf %61, %60 : vector<16x256xf32>
    %cst_31 = arith.constant 5.000000e-01 : f32
    %63 = vector.broadcast %cst_31 : f32 to vector<16x256xf32>
    %64 = arith.mulf %63, %62 : vector<16x256xf32>
    %65 = arith.mulf %52, %64 : vector<16x256xf32>
    %66 = arith.truncf %65 : vector<16x256xf32> to vector<16x256xbf16>
    %c0_32 = arith.constant 0 : index
    %c0_33 = arith.constant 0 : index
    %67 = vector.load %arg11[%c0_32, %c0_33] : memref<256x128xbf16, #tpu.memory_space<vmem>>, vector<256x128xbf16>
    %cst_34 = arith.constant dense<0.000000e+00> : vector<16x128xf32>
    %68 = tpu.matmul %66, %67, %cst_34 {dimension_numbers = #tpu.dot_dimension_numbers<[1], [0], [0], [1], [0, 0, 1, 1], [], []>} : vector<16x256xbf16>, vector<256x128xbf16>, vector<16x128xf32> -> vector<16x128xf32>
    %69 = arith.addf %49, %68 : vector<16x128xf32>
    %70 = vector.extract_strided_slice %69 {offsets = [0, 0], sizes = [8, 128], strides = [1, 1]} : vector<16x128xf32> to vector<8x128xf32>
    %cst_35 = arith.constant 3.000000e+00 : f32
    %71 = vector.broadcast %cst_35 : f32 to vector<8x128xf32>
    %72 = arith.mulf %71, %70 : vector<8x128xf32>
    %73 = vector.extract_strided_slice %69 {offsets = [8, 0], sizes = [8, 128], strides = [1, 1]} : vector<16x128xf32> to vector<8x128xf32>
    %cst_36 = arith.constant 2.000000e+00 : f32
    %74 = vector.broadcast %cst_36 : f32 to vector<8x128xf32>
    %75 = arith.mulf %74, %73 : vector<8x128xf32>
    %76 = arith.subf %72, %75 : vector<8x128xf32>
    %77 = arith.truncf %76 : vector<8x128xf32> to vector<8x128xbf16>
    %c0_37 = arith.constant 0 : index
    %c0_38 = arith.constant 0 : index
    %78 = vector.load %arg12[%c0_37, %c0_38] : memref<128x16xbf16, #tpu.memory_space<vmem>>, vector<128x16xbf16>
    %cst_39 = arith.constant dense<0.000000e+00> : vector<8x16xf32>
    %79 = tpu.matmul %77, %78, %cst_39 {dimension_numbers = #tpu.dot_dimension_numbers<[1], [0], [0], [1], [0, 0, 1, 1], [], []>} : vector<8x128xbf16>, vector<128x16xbf16>, vector<8x16xf32> -> vector<8x16xf32>
    %c0_40 = arith.constant 0 : index
    %80 = memref.load %arg0[%c0_40] : memref<1xf32, #tpu.memory_space<smem>>
    %81 = vector.broadcast %80 : f32 to vector<8x16xf32>
    %82 = arith.mulf %79, %81 : vector<8x16xf32>
    %83 = arith.addf %0, %82 : vector<8x16xf32>
    %c0_41 = arith.constant 0 : index
    %c0_42 = arith.constant 0 : index
    %84 = vector.load %arg13[%c0_41, %c0_42] : memref<8x16xf32, #tpu.memory_space<vmem>>, vector<8x16xf32>
    tpu.vector_store %arg13[%c0_41, %c0_42], %83 {strides = array<i32>} : memref<8x16xf32, #tpu.memory_space<vmem>>, vector<8x16xf32>,
    return
  }
}

</mosaic_0001>

<bundles_post_ra>
// kernel: tpu_custom_call.1
= control target key start
LH: loop header
LB: loop body
LE: loop exit
PB: predicated region body
PF: predicated region fallthrough
CT: control target
= control target key end

     0   :  { %19 = vsyncpa [#allocation4], 0  ;;  %s2012_s0 = inlined_call_operand.<no memory space> [shape: f32[1], index: 0, kind: input, shape index: {}]   ;;  %s2013_s1 = inlined_call_operand.vmem [shape: f32[1,128], index: 1, kind: input, shape index: {}]   ;;  %s2014_s2 = inlined_call_operand.vmem [shape: f32[8,16], index: 2, kind: input, shape index: {}]   ;;  %s2015_s3 = inlined_call_operand.vmem [shape: f32[16,128], index: 3, kind: input, shape index: {}]   ;;  %s2016_s4 = inlined_call_operand.vmem [shape: f32[16,128], index: 4, kind: input, shape index: {}]   ;;  %s2017_s5 = inlined_call_operand.hbm [shape: f32[16,128], index: 5, kind: input, shape index: {}]   ;;  %s2018_s6 = inlined_call_operand.hbm [shape: f32[16,16], index: 6, kind: input, shape index: {}]   ;;  %s2019_s7 = inlined_call_operand.hbm [shape: bf16[16,128], index: 7, kind: input, shape index: {}]   ;;  %s2020_s8 = inlined_call_operand.hbm [shape: bf16[128,384], index: 8, kind: input, shape index: {}]   ;;  %s2021_s9 = inlined_call_operand.vmem [shape: bf16[128,128], index: 9, kind: input, shape index: {}]   ;;  %s2022_s10 = inlined_call_operand.hbm [shape: bf16[128,256], index: 10, kind: input, shape index: {}]   ;;  %s2023_s11 = inlined_call_operand.hbm [shape: bf16[256,128], index: 11, kind: input, shape index: {}]   ;;  %s2024_s12 = inlined_call_operand.vmem [shape: bf16[128,16], index: 12, kind: input, shape index: {}]   ;;  %s2025_s13 = inlined_call_operand.hbm [shape: f32[8,16], index: 13, kind: output, shape index: {}]  }
   0x1   :  { %20 = vsyncpa [#allocation7], 0 }
   0x2   :  { %21 = vsyncpa [#allocation10], 0 }
   0x3   :  { %22 = vsyncpa [#allocation13], 0 }
   0x4   :  { %23 = vsyncpa [#allocation5], 0  ;;  %s1664_s25 = smov [#allocation6]   ;;  %s1665_s27 = smov [#allocation9]  }
   0x5   :  { %s51_s26 = sshll.u32 %s1664_s25, 4  ;;  %s75_s28 = sshll.u32 %s1665_s27, 4  ;;  %s52_s26 = int_to_ptr.vmem [resolvable:$true] %s51_s26  ;;  %s1750_s28 = int_to_ptr.vmem [resolvable:$true] %s75_s28 }
   0x6   :  { %s1500_s14 = scalar_lea.hbm %s2018_s6, 256 }
   0x7   :  { %p1501_p0 = scmp.ne.s32.totalorder %s2018_s6, %s1500_s14  ;;  %p1504_p1 = scmp.lt.u32.totalorder %s1500_s14, %s2018_s6 }
   0x9   :  { %p1506_p2 = pnand %p1504_p1, %p1501_p0 }
   0xb   :  { %1509 = shalt.err (!%p1506_p2)
}
   0xc   :  { %s1510_s19 = scalar_lea.vmem %s52_s26, 256  ;;  %p1515_p4 = scmp.lt.s32.totalorder %s52_s26, %s52_s26 }
   0xd   :  { %p1511_p3 = scmp.ne.s32.totalorder %s52_s26, %s1510_s19  ;;  %p1516_p5 = scmp.lt.s32.totalorder %s1510_s19, %s1510_s19 }
   0xf   :  { %p1517_p6 = por %p1516_p5, %p1515_p4 }
  0x11   :  { %p1518_p7 = pnand %p1517_p6, %p1511_p3 }
  0x13   :  { %1521 = shalt.err (!%p1518_p7)
}
  0x14   :  { %s1666_s20 = smov 128   ;;  %s1667_s21 = smov 8  }
  0x15   :  { %57 = dma.hbm_to_vmem [thread:$0]  %s2018_s6, 256, %s52_s26, [#allocation7], %s1666_s20, %s1666_s20, %s1667_s21  }
  0x16   :  { %s1522_s27 = scalar_lea.hbm %s2020_s8, 3072 }
  0x17   :  { %p1523_p8 = scmp.ne.s32.totalorder %s2020_s8, %s1522_s27  ;;  %p1526_p9 = scmp.lt.u32.totalorder %s1522_s27, %s2020_s8 }
  0x19   :  { %p1528_p10 = pnand %p1526_p9, %p1523_p8 }
  0x1b   :  { %1531 = shalt.err (!%p1528_p10)
}
  0x1c   :  { %s1532_s16 = scalar_lea.vmem %s1750_s28, 3072  ;;  %p1537_p12 = scmp.lt.s32.totalorder %s1750_s28, %s1750_s28 }
  0x1d   :  { %p1533_p11 = scmp.ne.s32.totalorder %s1750_s28, %s1532_s16  ;;  %p1538_p13 = scmp.lt.s32.totalorder %s1532_s16, %s1532_s16 }
  0x1f   :  { %p1539_p0 = por %p1538_p13, %p1537_p12 }
  0x21   :  { %p1540_p1 = pnand %p1539_p0, %p1533_p11 }
  0x23   :  { %1543 = shalt.err (!%p1540_p1)
}
  0x24   :  { %s1668_s6 = smov 192   ;;  %s1669_s26 = smov 12  }
  0x25   :  { %81 = dma.hbm_to_vmem [thread:$0]  %s2020_s8, 3072, %s1750_s28, [#allocation10], %s1668_s6, %s1668_s6, %s1669_s26  }
  0x26   :  { %s1670_s19 = smov [#allocation3]   ;;  %s1671_s23 = smov [#allocation8]  }
  0x27   :  { %s39_s22 = sshll.u32 %s1670_s19, 4  ;;  %s63_s24 = sshll.u32 %s1671_s23, 4  ;;  %s40_s22 = int_to_ptr.vmem [resolvable:$true] %s39_s22  ;;  %s1784_s24 = int_to_ptr.vmem [resolvable:$true] %s63_s24 }
  0x28   :  { %s1544_s29 = scalar_lea.hbm %s2017_s5, 256 }
  0x29   :  { %p1545_p2 = scmp.ne.s32.totalorder %s2017_s5, %s1544_s29  ;;  %p1548_p3 = scmp.lt.u32.totalorder %s1544_s29, %s2017_s5 }
  0x2b   :  { %p1550_p4 = pnand %p1548_p3, %p1545_p2 }
  0x2d   :  { %1553 = shalt.err (!%p1550_p4)
}
  0x2e   :  { %s1554_s8 = scalar_lea.vmem %s40_s22, 256  ;;  %p1559_p6 = scmp.lt.s32.totalorder %s40_s22, %s40_s22 }
  0x2f   :  { %p1555_p5 = scmp.ne.s32.totalorder %s40_s22, %s1554_s8  ;;  %p1560_p7 = scmp.lt.s32.totalorder %s1554_s8, %s1554_s8 }
  0x31   :  { %p1561_p8 = por %p1560_p7, %p1559_p6 }
  0x33   :  { %p1562_p9 = pnand %p1561_p8, %p1555_p5 }
  0x35   :  { %1565 = shalt.err (!%p1562_p9)
}
  0x36   :  { %45 = dma.hbm_to_vmem [thread:$0]  %s2017_s5, 256, %s40_s22, [#allocation4], %s1666_s20, %s1666_s20, %s1667_s21  }
  0x37   :  { %s1566_s18 = scalar_lea.hbm %s2019_s7, 128 }
  0x38   :  { %p1567_p10 = scmp.ne.s32.totalorder %s2019_s7, %s1566_s18  ;;  %p1570_p11 = scmp.lt.u32.totalorder %s1566_s18, %s2019_s7 }
  0x3a   :  { %p1572_p12 = pnand %p1570_p11, %p1567_p10 }
  0x3c   :  { %1575 = shalt.err (!%p1572_p12)
}
  0x3d   :  { %s1576_s29 = scalar_lea.vmem %s1784_s24, 128  ;;  %p1581_p0 = scmp.lt.s32.totalorder %s1784_s24, %s1784_s24 }
  0x3e   :  { %p1577_p13 = scmp.ne.s32.totalorder %s1784_s24, %s1576_s29  ;;  %p1582_p1 = scmp.lt.s32.totalorder %s1576_s29, %s1576_s29 }
  0x40   :  { %p1583_p2 = por %p1582_p1, %p1581_p0 }
  0x42   :  { %p1584_p3 = pnand %p1583_p2, %p1577_p13 }
  0x44   :  { %1587 = shalt.err (!%p1584_p3)
}
  0x45   :  { %s1672_s5 = smov 64   ;;  %s1673_s22 = smov 4  }
  0x46   :  { %69 = dma.hbm_to_vmem [thread:$0]  %s2019_s7, 128, %s1784_s24, [#allocation7], %s1672_s5, %s1672_s5, %s1673_s22  }
  0x47   :  { %s1674_s15 = smov [#allocation11]   ;;  %s1675_s8 = smov [#allocation12]  }
  0x48   :  { %s89_s16 = sshll.u32 %s1674_s15, 4  ;;  %s101_s28 = sshll.u32 %s1675_s8, 4  ;;  %s90_s16 = int_to_ptr.vmem [resolvable:$true] %s89_s16  ;;  %s1821_s28 = int_to_ptr.vmem [resolvable:$true] %s101_s28 }
  0x49   :  { %s1588_s17 = scalar_lea.hbm %s2022_s10, 2048 }
  0x4a   :  { %p1589_p4 = scmp.ne.s32.totalorder %s2022_s10, %s1588_s17  ;;  %p1592_p5 = scmp.lt.u32.totalorder %s1588_s17, %s2022_s10 }
  0x4c   :  { %p1594_p6 = pnand %p1592_p5, %p1589_p4 }
  0x4e   :  { %1597 = shalt.err (!%p1594_p6)
}
  0x4f   :  { %s1598_s7 = scalar_lea.vmem %s90_s16, 2048  ;;  %p1603_p8 = scmp.lt.s32.totalorder %s90_s16, %s90_s16 }
  0x50   :  { %p1599_p7 = scmp.ne.s32.totalorder %s90_s16, %s1598_s7  ;;  %p1604_p9 = scmp.lt.s32.totalorder %s1598_s7, %s1598_s7 }
  0x52   :  { %p1605_p10 = por %p1604_p9, %p1603_p8 }
  0x54   :  { %p1606_p11 = pnand %p1605_p10, %p1599_p7 }
  0x56   :  { %1609 = shalt.err (!%p1606_p11)
}
  0x57   :  { %95 = dma.hbm_to_vmem [thread:$0]  %s2022_s10, 2048, %s90_s16, [#allocation10], %s1666_s20, %s1666_s20, %s1667_s21  }
  0x58   :  { %s1610_s14 = scalar_lea.hbm %s2023_s11, 2048 }
  0x59   :  { %p1611_p12 = scmp.ne.s32.totalorder %s2023_s11, %s1610_s14  ;;  %p1614_p13 = scmp.lt.u32.totalorder %s1610_s14, %s2023_s11 }
  0x5b   :  { %p1616_p0 = pnand %p1614_p13, %p1611_p12 }
  0x5d   :  { %1619 = shalt.err (!%p1616_p0)
}
  0x5e   :  { %s1620_s17 = scalar_lea.vmem %s1821_s28, 2048  ;;  %p1625_p2 = scmp.lt.s32.totalorder %s1821_s28, %s1821_s28 }
  0x5f   :  { %p1621_p1 = scmp.ne.s32.totalorder %s1821_s28, %s1620_s17  ;;  %p1626_p3 = scmp.lt.s32.totalorder %s1620_s17, %s1620_s17 }
  0x61   :  { %p1627_p4 = por %p1626_p3, %p1625_p2 }
  0x63   :  { %p1628_p5 = pnand %p1627_p4, %p1621_p1 }
  0x65   :  { %1631 = shalt.err (!%p1628_p5)
}
  0x66   :  { %107 = dma.hbm_to_vmem [thread:$0]  %s2023_s11, 2048, %s1821_s28, [#allocation13], %s1672_s5, %s1672_s5, %s1673_s22  }
  0x67   :  { %1654 = dma.done.wait [#allocation4], 256  }
  0x68   :  { %1655 = vsyncadd [#allocation4], 4294967040 }
  0x69   :  { %1656 = dma.done.wait [#allocation7], 384  }
  0x6a   :  { %1657 = vsyncadd [#allocation7], 4294966912 }
  0x6b   :  { %1658 = dma.done.wait [#allocation10], 5120  }
  0x6c   :  { %1659 = vsyncadd [#allocation10], 4294962176 }
  0x6d   :  { %1660 = dma.done.wait [#allocation13], 2048  }
  0x6e   :  { %1661 = vsyncadd [#allocation13], 4294965248  ;;  %v1676_v0 = vmov 0.0   ;;  %vm1677_vm0 = vmmov 0   ;;  %v1395_v1 = vld [vmem:[#allocation8] sm:$0xff]   ;;  %vm140_vm1 = vcmask 130048  }
  0x6f   :  { %1301 = vmatprep.subr.bf16.mxu0 %v1676_v0  ;;  %1303 = vmatprep.mubr.msk.bf16.mxu0 %vm1677_vm0, %v1676_v0  ;;  %v1864_v2 = vld [vmem:[%s2014_s2] sm:$0xff]  ;;  %v1396_v4 = vld [vmem:[#allocation9 + $0x4] ss:$12 sps:$4 sm:$0xff]   ;;  %v1398_v5 = vld [vmem:[#allocation9] ss:$12 sps:$4 sm:$0xff]   ;;  %v1678_v28 = vmov 0  }
  0x70   :  { %1302 = vmatpush3.bf16.msra.mxu0 %v1395_v1  ;;  %v131_v3 = vpack.c.bf16 %v1864_v2, %v1864_v2  ;;  %v1399_v6 = vld [vmem:[#allocation9 + $0x8] ss:$12 sps:$4 sm:$0xff]   ;;  %361 = vmatprep.subr.bf16.mxu1 %v1396_v4  ;;  %v1402_v8 = vld [vmem:[#allocation9 + $0x18] ss:$12 sps:$4 sm:$0xff]   ;;  %v1403_v9 = vld [vmem:[#allocation9 + $0x20] ss:$12 sps:$4 sm:$0xff]  }
  0x71   :  { %1307 = vmatprep.subr.bf16.mxu0 %v1676_v0  ;;  %v1400_v7 = vld [vmem:[#allocation9 + $0x1c] ss:$12 sps:$4 sm:$0xff]   ;;  %362 = vmatpush1.bf16.msra.mxu1 %v1398_v5  ;;  %v1404_v10 = vld [vmem:[#allocation9 + $0x34] ss:$12 sps:$4 sm:$0xff]   ;;  %v1407_v12 = vld [vmem:[#allocation9 + $0x38] ss:$12 sps:$4 sm:$0xff]  }
  0x72   :  { %363 = vmatprep.subr.bf16.mxu1 %v1400_v7  ;;  %v1406_v11 = vld [vmem:[#allocation9 + $0x30] ss:$12 sps:$4 sm:$0xff]   ;;  %v1408_v13 = vld [vmem:[#allocation9 + $0x4c] ss:$12 sps:$4 sm:$0xff]   ;;  %v1410_v14 = vld [vmem:[#allocation9 + $0x48] ss:$12 sps:$4 sm:$0xff]   ;;  %393 = vmatprep.mubr.bf16.mxu1 %v1678_v28 }
  0x73   :  { %1304 = vmatmul.mubr.msk.bf16.vlgmr.msra.gmra.mrb[0].mxu0 %vm140_vm1, %v131_v3  ;;  %v1411_v15 = vld [vmem:[#allocation9 + $0x50] ss:$12 sps:$4 sm:$0xff]   ;;  %v1414_v17 = vld [vmem:[#allocation9 + $0x60] ss:$12 sps:$4 sm:$0xff]   ;;  %v1415_v18 = vld [vmem:[#allocation9 + $0x68] ss:$12 sps:$4 sm:$0xff]  }
  0x74   :  { %1308 = vmatpush3.bf16.msra.mxu0 %v1399_v6  ;;  %1323 = vmatprep.mubr.msk.bf16.mxu0 %vm1677_vm0, %v1676_v0  ;;  %v1412_v16 = vld [vmem:[#allocation9 + $0x64] ss:$12 sps:$4 sm:$0xff]   ;;  %v1416_v19 = vld [vmem:[#allocation9 + $0x7c] ss:$12 sps:$4 sm:$0xff]   ;;  %v1419_v21 = vld [vmem:[#allocation9 + $0x80] ss:$12 sps:$4 sm:$0xff]  }
  0x75   :  { %1309 = vmatprep.subr.bf16.mxu0 %v1676_v0  ;;  %364 = vmatpush1.bf16.msra.mxu1 %v1402_v8  ;;  %v1418_v20 = vld [vmem:[#allocation9 + $0x78] ss:$12 sps:$4 sm:$0xff]   ;;  %v1420_v22 = vld [vmem:[#allocation9 + $0x94] ss:$12 sps:$4 sm:$0xff]   ;;  %v1422_v23 = vld [vmem:[#allocation9 + $0x90] ss:$12 sps:$4 sm:$0xff]  }
  0x76   :  { %365 = vmatprep.subr.bf16.mxu1 %v1404_v10  ;;  %v1423_v24 = vld [vmem:[#allocation9 + $0x98] ss:$12 sps:$4 sm:$0xff]   ;;  %v1426_v26 = vld [vmem:[#allocation9 + $0xa8] ss:$12 sps:$4 sm:$0xff]   ;;  %v1427_v27 = vld [vmem:[#allocation9 + $0xb0] ss:$12 sps:$4 sm:$0xff]  }
  0x77   :  { %v1424_v25 = vld [vmem:[#allocation9 + $0xac] ss:$12 sps:$4 sm:$0xff]   ;;  %v185_v30 = vld [vmem:[%s2015_s3 + $0x8] sm:$0xff] }
  0x78   :  { %1310 = vmatpush3.bf16.msra.mxu0 %v1403_v9  ;;  %v184_v29 = vld [vmem:[%s2015_s3] sm:$0xff]  ;;  %v197_v54 = vld [vmem:[%s2016_s4 + $0x8] sm:$0xff] }
  0x79   :  { %1311 = vmatprep.subr.bf16.mxu0 %v1676_v0  ;;  %366 = vmatpush1.bf16.msra.mxu1 %v1406_v11  ;;  %v1172_v31 = vld [vmem:[%s2013_s1] ss:$0 sm:$0xff]  ;;  %v199_v55 = vld [vmem:[#allocation3 + $0x8] sm:$0xff]  ;;  %v510_v11 = vld [vmem:[#allocation6] sm:$0xff] }
  0x7a   :  { %367 = vmatprep.subr.bf16.mxu1 %v1408_v13  ;;  %v198_v50 = vld [vmem:[#allocation3] sm:$0xff] }
  0x7b   :  { %v196_v53 = vld [vmem:[%s2016_s4] sm:$0xff] }
  0x7c   :  { %1312 = vmatpush3.bf16.msra.mxu0 %v1407_v12 }
  0x7d   :  { %1313 = vmatprep.subr.bf16.mxu0 %v1676_v0  ;;  %368 = vmatpush1.bf16.msra.mxu1 %v1410_v14 }
  0x7e   :  { %369 = vmatprep.subr.bf16.mxu1 %v1412_v16 }
  0x80   :  { %1314 = vmatpush3.bf16.msra.mxu0 %v1411_v15  ;;  %v511_v15 = vld [vmem:[#allocation6 + $0x8] sm:$0xff] }
  0x81   :  { %1315 = vmatprep.subr.bf16.mxu0 %v1676_v0  ;;  %370 = vmatpush1.bf16.msra.mxu1 %v1414_v17 }
  0x82   :  { %371 = vmatprep.subr.bf16.mxu1 %v1416_v19 }
  0x84   :  { %1316 = vmatpush3.bf16.msra.mxu0 %v1415_v18 }
  0x85   :  { %1317 = vmatprep.subr.bf16.mxu0 %v1676_v0  ;;  %372 = vmatpush1.bf16.msra.mxu1 %v1418_v20 }
  0x86   :  { %373 = vmatprep.subr.bf16.mxu1 %v1420_v22 }
  0x88   :  { %1318 = vmatpush3.bf16.msra.mxu0 %v1419_v21 }
  0x89   :  { %1319 = vmatprep.subr.bf16.mxu0 %v1676_v0  ;;  %374 = vmatpush1.bf16.msra.mxu1 %v1422_v23 }
  0x8a   :  { %375 = vmatprep.subr.bf16.mxu1 %v1424_v25 }
  0x8c   :  { %1320 = vmatpush3.bf16.msra.mxu0 %v1423_v24 }
  0x8d   :  { %1321 = vmatprep.subr.bf16.mxu0 %v1676_v0  ;;  %376 = vmatpush1.bf16.msra.mxu1 %v1426_v26 }
  0x8e   :  { %1327 = vmatprep.subr.bf16.mxu1 %v1676_v0 }
  0x90   :  { %1322 = vmatpush3.bf16.msra.mxu0 %v1427_v27 }
  0x91   :  { %1333 = vmatprep.subr.bf16.mxu0 %v1676_v0 }
 0x146   :  { %v178_v32 = vpop.f32.mrb[0].mxu0 }
 0x147   :  { %v186_v33 = vadd.f32 %v184_v29, %v178_v32  ;;  %v187_v34 = vadd.f32 %v185_v30, %v178_v32  ;;  %v1305_v35 = vpop.f32.mrb[1].mxu0 }
 0x148   :  { %v181_v36 = vpop.f32.mrb[2].mxu0  ;;  %v1430_v35 = vld [vmem:[%s2021_s9 + $0x10] sm:$0xff]  }
 0x149   :  { %v1891_v37 = vadd.f32 %v1172_v31, %v186_v33  ;;  %v1893_v38 = vadd.f32 %v1172_v31, %v187_v34  ;;  %v1306_v39 = vpop.f32.mrb[3].mxu0  ;;  %v1428_v33 = vld [vmem:[%s2021_s9] sm:$0xff]   ;;  %v1429_v34 = vld [vmem:[%s2021_s9 + $0x8] sm:$0xff]   ;;  %v1431_v36 = vld [vmem:[%s2021_s9 + $0x18] sm:$0xff]  }
 0x14a   :  { %v1432_v39 = vld [vmem:[%s2021_s9 + $0x20] sm:$0xff]  }
 0x14b   :  { %v200_v40 = vpack.c.bf16 %v1893_v38, %v1891_v37 }
 0x14d   :  { %394 = vmatmul.mubr.bf16.vlgmr.msra.gmra.mrb[0].mxu1 %v200_v40  ;;  %1324 = vmatmul.mubr.bf16.vlgmr.msra.gmra.mrb[4].mxu0 %v200_v40  ;;  %v1433_v40 = vld [vmem:[%s2021_s9 + $0x28] sm:$0xff]  }
 0x14e   :  { %1329 = vmatprep.mubr.msk.bf16.mxu1 %vm1677_vm0, %v1676_v0  ;;  %1335 = vmatprep.mubr.msk.bf16.mxu0 %vm1677_vm0, %v1676_v0 }
 0x220   :  { %v395_v41 = vpop.f32.mrb[0].mxu1  ;;  %v438_v42 = vpop.f32.mrb[4].mxu0 }
 0x221   :  { %447 = vrot.lane.b32.xlu1 %v395_v41, %s1672_s5  ;;  %v397_v43 = vpop.f32.mrb[1].mxu1  ;;  %v1325_v44 = vpop.f32.mrb[5].mxu0  ;;  %v445_v59 = vmul.f32 %v395_v41, %v196_v53  ;;  %v1434_v41 = vld [vmem:[%s2021_s9 + $0x30] sm:$0xff]  }
 0x222   :  { %457 = vrot.lane.b32.xlu0 %v397_v43, %s1672_s5  ;;  %v399_v45 = vpop.f32.mrb[2].mxu1  ;;  %v441_v46 = vpop.f32.mrb[6].mxu0  ;;  %v455_v63 = vmul.f32 %v397_v43, %v196_v53  ;;  %v1439_v53 = vld [vmem:[#allocation11 + $0x10] ss:$8 sps:$4 sm:$0xff]  }
 0x223   :  { %v537_v47 = vpack.c.bf16 %v441_v46, %v438_v42  ;;  %v401_v48 = vpop.f32.mrb[3].mxu1  ;;  %v1326_v49 = vpop.f32.mrb[7].mxu0  ;;  %v446_v60 = vmul.f32 %v399_v45, %v197_v54 }
 0x224   :  { %v456_v1 = vmul.f32 %v401_v48, %v197_v54  ;;  %v1435_v49 = vld [vmem:[%s2021_s9 + $0x38] sm:$0xff]   ;;  %v1444_v54 = vld [vmem:[#allocation11 + $0x24] ss:$8 sps:$4 sm:$0xff]  }
 0x225   :  { %449 = vrot.lane.b32.xlu1 %v399_v45, %s1672_s5  ;;  %1334 = vmatpush3.bf16.msra.mxu0 %v537_v47 }
 0x226   :  { %459 = vrot.lane.b32.xlu0 %v401_v48, %s1672_s5 }
 0x293   :  { %v448_v51 = vpop.permute.xlu1 %447 }
 0x294   :  { %v458_v52 = vpop.permute.xlu0 %457  ;;  %v451_v56 = vmul.f32 %v448_v51, %v198_v50  ;;  %v1438_v51 = vld [vmem:[#allocation11 + $0x4] ss:$8 sps:$4 sm:$0xff]  }
 0x295   :  { %v461_v57 = vmul.f32 %v458_v52, %v198_v50  ;;  %v1436_v50 = vld [vmem:[#allocation11] ss:$8 sps:$4 sm:$0xff]   ;;  %v1441_v52 = vld [vmem:[#allocation11 + $0x14] ss:$8 sps:$4 sm:$0xff]   ;;  %787 = vmatprep.subr.bf16.mxu0 %v1438_v51 }
 0x296   :  { %v453_v4 = vadd.f32 %v451_v56, %v445_v59  ;;  %v1447_v56 = vld [vmem:[#allocation11 + $0x34] ss:$8 sps:$4 sm:$0xff]  }
 0x297   :  { %v450_v58 = vpop.permute.xlu1 %449  ;;  %v463_v6 = vadd.f32 %v461_v57, %v455_v63  ;;  %v1445_v57 = vld [vmem:[#allocation11 + $0x30] ss:$8 sps:$4 sm:$0xff]   ;;  %v1453_v59 = vld [vmem:[#allocation11 + $0x54] ss:$8 sps:$4 sm:$0xff]  }
 0x298   :  { %v452_v61 = vmul.f32 %v450_v58, %v199_v55  ;;  %v460_v62 = vpop.permute.xlu0 %459  ;;  %v1448_v58 = vld [vmem:[#allocation11 + $0x40] ss:$8 sps:$4 sm:$0xff]  }
 0x299   :  { %v462_v3 = vmul.f32 %v460_v62, %v199_v55  ;;  %v1442_v55 = vld [vmem:[#allocation11 + $0x20] ss:$8 sps:$4 sm:$0xff]  }
 0x29a   :  { %v454_v5 = vadd.f32 %v452_v61, %v446_v60  ;;  %v1451_v60 = vld [vmem:[#allocation11 + $0x50] ss:$8 sps:$4 sm:$0xff]   ;;  %v1456_v61 = vld [vmem:[#allocation11 + $0x64] ss:$8 sps:$4 sm:$0xff]   ;;  %v1454_v62 = vld [vmem:[#allocation11 + $0x60] ss:$8 sps:$4 sm:$0xff]  }
 0x29b   :  { %v464_v7 = vadd.f32 %v462_v3, %v456_v1 }
 0x29c   :  { %v465_v8 = vpack.c.bf16 %v454_v5, %v453_v4 }
 0x29d   :  { %v466_v9 = vpack.c.bf16 %v464_v7, %v463_v6  ;;  %v1459_v6 = vld [vmem:[#allocation11 + $0x74] ss:$8 sps:$4 sm:$0xff]   ;;  %v1457_v7 = vld [vmem:[#allocation11 + $0x70] ss:$8 sps:$4 sm:$0xff]  }
 0x29f   :  { %1328 = vmatpush3.bf16.xpose.msra.mxu1 %v466_v9 }
 0x2a0   :  { %1339 = vmatprep.subr.bf16.mxu1 %v1676_v0 }
 0x2a6   :  { %1330 = vmatmul.mubr.bf16.vlgmr.msra.gmra.mrb[4].mxu1 %v465_v8 }
 0x2a7   :  { %1355 = vmatprep.mubr.msk.bf16.mxu1 %vm1677_vm0, %v1676_v0  ;;  %1340 = vmatpush3.bf16.msra.mxu1 %v1428_v33  ;;  %v1479_v33 = vld [vmem:[%s2024_s12 + $0x18] sm:$0xff]  }
 0x2a8   :  { %1341 = vmatprep.subr.bf16.mxu1 %v1676_v0 }
 0x2ab   :  { %1342 = vmatpush3.bf16.msra.mxu1 %v1429_v34  ;;  %v1480_v34 = vld [vmem:[%s2024_s12 + $0x20] sm:$0xff]  }
 0x2ac   :  { %1343 = vmatprep.subr.bf16.mxu1 %v1676_v0 }
 0x2af   :  { %1344 = vmatpush3.bf16.msra.mxu1 %v1430_v35 }
 0x2b0   :  { %1345 = vmatprep.subr.bf16.mxu1 %v1676_v0 }
 0x2b3   :  { %1346 = vmatpush3.bf16.msra.mxu1 %v1431_v36 }
 0x2b4   :  { %1347 = vmatprep.subr.bf16.mxu1 %v1676_v0 }
 0x2b7   :  { %1348 = vmatpush3.bf16.msra.mxu1 %v1432_v39 }
 0x2b8   :  { %1349 = vmatprep.subr.bf16.mxu1 %v1676_v0 }
 0x2bb   :  { %1350 = vmatpush3.bf16.msra.mxu1 %v1433_v40 }
 0x2bc   :  { %1351 = vmatprep.subr.bf16.mxu1 %v1676_v0 }
 0x2bf   :  { %1352 = vmatpush3.bf16.msra.mxu1 %v1434_v41 }
 0x2c0   :  { %1353 = vmatprep.subr.bf16.mxu1 %v1676_v0 }
 0x2c3   :  { %1354 = vmatpush3.bf16.msra.mxu1 %v1435_v49 }
 0x379   :  { %v501_v10 = vpop.f32.mrb[4].mxu1 }
 0x37a   :  { %v508_v12 = vmul.f32 0.088388346, %v501_v10  ;;  %v1331_v13 = vpop.f32.mrb[5].mxu1 }
 0x37b   :  { %v504_v14 = vpop.f32.mrb[6].mxu1 }
 0x37c   :  { %v509_v16 = vmul.f32 0.088388346, %v504_v14  ;;  %v1332_v17 = vpop.f32.mrb[7].mxu1  ;;  %v512_v18 = vadd.f32 %v510_v11, %v508_v12 }
 0x37d   :  { %v1462_v17 = vld [vmem:[#allocation12 + $0x48] sm:$0xff]  }
 0x37e   :  { %v514_v19 = vsel %vm140_vm1, %v512_v18, -inf  ;;  %v513_v20 = vadd.f32 %v511_v15, %v509_v16  ;;  %v1460_v15 = vld [vmem:[#allocation12 + $0x40] sm:$0xff]  }
 0x37f   :  { %515 = vmax.xlane.f32.xlu0 %v514_v19  ;;  %v1461_v16 = vld [vmem:[#allocation12] sm:$0xff]   ;;  %1270 = vmatprep.subr.bf16.mxu1 %v1460_v15  ;;  %v1465_v19 = vld [vmem:[#allocation12 + $0x10] sm:$0xff]  }
 0x380   :  { %v517_v21 = vsel %vm140_vm1, %v513_v20, -inf }
 0x381   :  { %518 = vmax.xlane.f32.xlu1 %v517_v21  ;;  %v1468_v21 = vld [vmem:[#allocation12 + $0x60] sm:$0xff]  }
 0x40c   :  { %v516_v22 = vpop.xlane.xlu0 %515 }
 0x40d   :  { %v520_v23 = vsub.f32 %v512_v18, %v516_v22  ;;  %v1463_v18 = vld [vmem:[#allocation12 + $0x8] sm:$0xff]   ;;  %v1469_v22 = vld [vmem:[#allocation12 + $0x20] sm:$0xff]  }
 0x40e   :  { %v519_v24 = vpop.xlane.xlu1 %518 }
 0x40f   :  { %v522_v25 = vmul.f32 1.442695, %v520_v23  ;;  %v521_v26 = vsub.f32 %v513_v20, %v519_v24  ;;  %v1467_v20 = vld [vmem:[#allocation12 + $0x18] sm:$0xff]   ;;  %v1470_v23 = vld [vmem:[#allocation12 + $0x68] sm:$0xff]  }
 0x410   :  { %v1471_v24 = vld [vmem:[#allocation12 + $0x28] sm:$0xff]  }
 0x411   :  { %1484 = vpow2.f32 %v522_v25  ;;  %v524_v27 = vmul.f32 1.442695, %v521_v26  ;;  %v1472_v25 = vld [vmem:[#allocation12 + $0x70] sm:$0xff]  }
 0x412   :  { %v1473_v26 = vld [vmem:[#allocation12 + $0x30] sm:$0xff]  }
 0x413   :  { %1486 = vpow2.f32 %v524_v27  ;;  %v1474_v27 = vld [vmem:[#allocation12 + $0x78] sm:$0xff]  }
 0x41b   :  { %v1485_v29 = vpop.eup %1484 }
 0x41c   :  { %v526_v30 = vsel %vm140_vm1, %v1485_v29, 0.0 }
 0x41d   :  { %v1487_v31 = vpop.eup %1486  ;;  %527 = vadd.xlane.f32.xlu0 %v526_v30  ;;  %v1476_v30 = vld [vmem:[%s2024_s12] sm:$0xff]  }
 0x41e   :  { %v529_v32 = vsel %vm140_vm1, %v1487_v31, 0.0 }
 0x421   :  { %530 = vadd.xlane.f32.xlu0 %v529_v32  ;;  %v1478_v32 = vld [vmem:[%s2024_s12 + $0x10] sm:$0xff]  }
 0x4aa   :  { %v528_v42 = vpop.xlane.xlu0 %527 }
 0x4ab   :  { %1488 = vrcp.f32 %v528_v42 }
 0x4ae   :  { %v531_v43 = vpop.xlane.xlu0 %530 }
 0x4af   :  { %1490 = vrcp.f32 %v531_v43 }
 0x4b5   :  { %v1489_v44 = vpop.eup %1488 }
 0x4b6   :  { %v534_v46 = vmul.f32 %v1489_v44, %v1485_v29  ;;  %v1475_v29 = vld [vmem:[#allocation12 + $0x38] sm:$0xff]  }
 0x4b9   :  { %v1491_v45 = vpop.eup %1490 }
 0x4ba   :  { %v535_v47 = vmul.f32 %v1491_v45, %v1487_v31  ;;  %v1477_v31 = vld [vmem:[%s2024_s12 + $0x8] sm:$0xff]  }
 0x4bc   :  { %v536_v48 = vpack.c.bf16 %v535_v47, %v534_v46 }
 0x4be   :  { %1336 = vmatmul.mubr.msk.bf16.vlgmr.msra.gmra.mrb[8].mxu0 %vm140_vm1, %v536_v48 }
 0x4bf   :  { %819 = vmatprep.mubr.bf16.mxu0 %v1678_v28  ;;  %788 = vmatpush1.bf16.msra.mxu0 %v1436_v50  ;;  %v1450_v28 = vld [vmem:[#allocation11 + $0x44] ss:$8 sps:$4 sm:$0xff]  }
 0x4c0   :  { %789 = vmatprep.subr.bf16.mxu0 %v1441_v52 }
 0x4c3   :  { %790 = vmatpush1.bf16.msra.mxu0 %v1439_v53 }
 0x4c4   :  { %791 = vmatprep.subr.bf16.mxu0 %v1444_v54 }
 0x4c7   :  { %792 = vmatpush1.bf16.msra.mxu0 %v1442_v55 }
 0x4c8   :  { %793 = vmatprep.subr.bf16.mxu0 %v1447_v56 }
 0x4cb   :  { %794 = vmatpush1.bf16.msra.mxu0 %v1445_v57 }
 0x4cc   :  { %795 = vmatprep.subr.bf16.mxu0 %v1450_v28 }
 0x4cf   :  { %796 = vmatpush1.bf16.msra.mxu0 %v1448_v58 }
 0x4d0   :  { %797 = vmatprep.subr.bf16.mxu0 %v1453_v59 }
 0x4d3   :  { %798 = vmatpush1.bf16.msra.mxu0 %v1451_v60 }
 0x4d4   :  { %799 = vmatprep.subr.bf16.mxu0 %v1456_v61 }
 0x4d7   :  { %800 = vmatpush1.bf16.msra.mxu0 %v1454_v62 }
 0x4d8   :  { %801 = vmatprep.subr.bf16.mxu0 %v1459_v6 }
 0x4db   :  { %802 = vmatpush1.bf16.msra.mxu0 %v1457_v7 }
 0x4dc   :  { %1359 = vmatprep.subr.bf16.mxu0 %v1676_v0 }
 0x591   :  { %v575_v63 = vpop.f32.mrb[8].mxu0 }
 0x592   :  { %v1337_v1 = vpop.f32.mrb[9].mxu0 }
 0x593   :  { %v578_v3 = vpop.f32.mrb[10].mxu0 }
 0x594   :  { %v582_v4 = vpack.c.bf16 %v578_v3, %v575_v63  ;;  %v1338_v5 = vpop.f32.mrb[11].mxu0 }
 0x596   :  { %1356 = vmatmul.mubr.bf16.vlgmr.msra.gmra.mrb[8].mxu1 %v582_v4 }
 0x597   :  { %1271 = vmatpush3.bf16.msra.mxu1 %v1461_v16 }
 0x598   :  { %1272 = vmatprep.subr.bf16.mxu1 %v1462_v17 }
 0x59b   :  { %1273 = vmatpush3.bf16.msra.mxu1 %v1463_v18  ;;  %v1481_v18 = vld [vmem:[%s2024_s12 + $0x28] sm:$0xff]  }
 0x669   :  { %v681_v8 = vpop.f32.mrb[8].mxu1 }
 0x66a   :  { %v1357_v9 = vpop.f32.mrb[9].mxu1  ;;  %v1953_v11 = vadd.f32 %v681_v8, %v1891_v37  ;;  %v1464_v37 = vld [vmem:[#allocation12 + $0x50] sm:$0xff]  }
 0x66b   :  { %v684_v10 = vpop.f32.mrb[10].mxu1  ;;  %1274 = vmatprep.subr.bf16.mxu1 %v1464_v37  ;;  %v1482_v37 = vld [vmem:[%s2024_s12 + $0x30] sm:$0xff]  }
 0x66c   :  { %v1956_v12 = vadd.f32 %v684_v10, %v1893_v38  ;;  %v1358_v13 = vpop.f32.mrb[11].mxu1  ;;  %1275 = vmatpush3.bf16.msra.mxu1 %v1465_v19  ;;  %v1466_v38 = vld [vmem:[#allocation12 + $0x58] sm:$0xff]   ;;  %v1483_v19 = vld [vmem:[%s2024_s12 + $0x38] sm:$0xff]   ;;  %s1679_s12 = smov [#allocation14]  }
 0x66d   :  { %1276 = vmatprep.subr.bf16.mxu1 %v1466_v38  ;;  %s1158_s30 = sshll.u32 %s1679_s12, 4  ;;  %s1159_s30 = int_to_ptr.vmem [resolvable:$true] %s1158_s30 }
 0x66e   :  { %v690_v14 = vpack.c.bf16 %v1956_v12, %v1953_v11  ;;  %s1632_s14 = scalar_lea.vmem %s1159_s30, 128  ;;  %p1637_p7 = scmp.lt.s32.totalorder %s1159_s30, %s1159_s30 }
 0x66f   :  { %p1633_p6 = scmp.ne.s32.totalorder %s1159_s30, %s1632_s14  ;;  %p1638_p8 = scmp.lt.s32.totalorder %s1632_s14, %s1632_s14 }
 0x670   :  { %820 = vmatmul.mubr.bf16.vlgmr.msra.gmra.mrb[12].mxu0 %v690_v14  ;;  %1277 = vmatpush3.bf16.msra.mxu1 %v1467_v20 }
 0x671   :  { %1375 = vmatprep.mubr.msk.bf16.mxu0 %vm1677_vm0, %v1676_v0  ;;  %1278 = vmatprep.subr.bf16.mxu1 %v1468_v21  ;;  %p1639_p9 = por %p1638_p8, %p1637_p7 }
 0x672   :  { %1360 = vmatpush3.bf16.msra.mxu0 %v1476_v30 }
 0x673   :  { %1361 = vmatprep.subr.bf16.mxu0 %v1676_v0  ;;  %p1640_p10 = pnand %p1639_p9, %p1633_p6 }
 0x674   :  { %1279 = vmatpush3.bf16.msra.mxu1 %v1469_v22 }
 0x675   :  { %1280 = vmatprep.subr.bf16.mxu1 %v1470_v23 }
 0x676   :  { %1362 = vmatpush3.bf16.msra.mxu0 %v1477_v31 }
 0x677   :  { %1363 = vmatprep.subr.bf16.mxu0 %v1676_v0 }
 0x678   :  { %1281 = vmatpush3.bf16.msra.mxu1 %v1471_v24 }
 0x679   :  { %1282 = vmatprep.subr.bf16.mxu1 %v1472_v25 }
 0x67a   :  { %1364 = vmatpush3.bf16.msra.mxu0 %v1478_v32 }
 0x67b   :  { %1365 = vmatprep.subr.bf16.mxu0 %v1676_v0 }
 0x67c   :  { %1283 = vmatpush3.bf16.msra.mxu1 %v1473_v26 }
 0x67d   :  { %1284 = vmatprep.subr.bf16.mxu1 %v1474_v27 }
 0x67e   :  { %1366 = vmatpush3.bf16.msra.mxu0 %v1479_v33 }
 0x67f   :  { %1367 = vmatprep.subr.bf16.mxu0 %v1676_v0 }
 0x680   :  { %1285 = vmatpush3.bf16.msra.mxu1 %v1475_v29 }
 0x682   :  { %1368 = vmatpush3.bf16.msra.mxu0 %v1480_v34 }
 0x683   :  { %1369 = vmatprep.subr.bf16.mxu0 %v1676_v0 }
 0x686   :  { %1370 = vmatpush3.bf16.msra.mxu0 %v1481_v18 }
 0x687   :  { %1371 = vmatprep.subr.bf16.mxu0 %v1676_v0 }
 0x68a   :  { %1372 = vmatpush3.bf16.msra.mxu0 %v1482_v37 }
 0x68b   :  { %1373 = vmatprep.subr.bf16.mxu0 %v1676_v0  ;;  %v1148_v0 = vstv %s2012_s0 }
 0x68e   :  { %1374 = vmatpush3.bf16.msra.mxu0 %v1483_v19 }
 0x743   :  { %v821_v35 = vpop.f32.mrb[12].mxu0 }
 0x744   :  { %v830_v36 = vmul.f32 %v821_v35, %v821_v35  ;;  %v823_v39 = vpop.f32.mrb[13].mxu0 }
 0x745   :  { %v831_v40 = vmul.f32 %v823_v39, %v823_v39  ;;  %v825_v41 = vpop.f32.mrb[14].mxu0 }
 0x746   :  { %v834_v42 = vmul.f32 %v830_v36, %v821_v35  ;;  %v832_v43 = vmul.f32 %v825_v41, %v825_v41  ;;  %v827_v44 = vpop.f32.mrb[15].mxu0 }
 0x747   :  { %v835_v45 = vmul.f32 %v831_v40, %v823_v39  ;;  %v833_v46 = vmul.f32 %v827_v44, %v827_v44 }
 0x748   :  { %v838_v47 = vmul.f32 0.044715, %v834_v42  ;;  %v836_v48 = vmul.f32 %v832_v43, %v825_v41 }
 0x749   :  { %v839_v49 = vmul.f32 0.044715, %v835_v45  ;;  %v837_v50 = vmul.f32 %v833_v46, %v827_v44 }
 0x74a   :  { %v842_v51 = vadd.f32 %v838_v47, %v821_v35  ;;  %v840_v52 = vmul.f32 0.044715, %v836_v48 }
 0x74b   :  { %v843_v53 = vadd.f32 %v839_v49, %v823_v39  ;;  %v841_v54 = vmul.f32 0.044715, %v837_v50 }
 0x74c   :  { %v846_v55 = vmul.f32 0.7978846, %v842_v51  ;;  %v844_v56 = vadd.f32 %v840_v52, %v825_v41 }
 0x74d   :  { %v847_v57 = vmul.f32 0.7978846, %v843_v53  ;;  %v845_v28 = vadd.f32 %v841_v54, %v827_v44 }
 0x74e   :  { %1492 = vtanh.f32 %v846_v55  ;;  %v848_v58 = vmul.f32 0.7978846, %v844_v56 }
 0x74f   :  { %1494 = vtanh.f32 %v847_v57  ;;  %v849_v59 = vmul.f32 0.7978846, %v845_v28 }
 0x750   :  { %1496 = vtanh.f32 %v848_v58 }
 0x751   :  { %1498 = vtanh.f32 %v849_v59 }
 0x758   :  { %v1493_v60 = vpop.eup %1492 }
 0x759   :  { %v1495_v61 = vpop.eup %1494  ;;  %v854_v62 = vadd.f32 1.0, %v1493_v60 }
 0x75a   :  { %v1497_v63 = vpop.eup %1496  ;;  %v855_v1 = vadd.f32 1.0, %v1495_v61 }
 0x75b   :  { %v1499_v3 = vpop.eup %1498  ;;  %v858_v4 = vmul.f32 0.5, %v854_v62  ;;  %v856_v5 = vadd.f32 1.0, %v1497_v63 }
 0x75c   :  { %v859_v6 = vmul.f32 0.5, %v855_v1  ;;  %v857_v7 = vadd.f32 1.0, %v1499_v3 }
 0x75d   :  { %v860_v8 = vmul.f32 0.5, %v856_v5  ;;  %v862_v10 = vmul.f32 %v858_v4, %v821_v35 }
 0x75e   :  { %v861_v9 = vmul.f32 0.5, %v857_v7  ;;  %v863_v14 = vmul.f32 %v859_v6, %v823_v39 }
 0x75f   :  { %v864_v13 = vmul.f32 %v860_v8, %v825_v41 }
 0x760   :  { %v865_v15 = vmul.f32 %v861_v9, %v827_v44 }
 0x761   :  { %v866_v16 = vpack.c.bf16 %v864_v13, %v862_v10 }
 0x762   :  { %v867_v17 = vpack.c.bf16 %v865_v15, %v863_v14 }
 0x764   :  { %1028 = vmatprep.mubr.bf16.mxu1 %v867_v17 }
 0x765   :  { %1029 = vmatmul.mubr.bf16.vlgmr.msra.gmra.mrb[12].mxu1 %v866_v16 }
 0x838   :  { %v1286_v38 = vpop.f32.mrb[12].mxu1 }
 0x839   :  { %v1287_v20 = vpop.f32.mrb[13].mxu1 }
 0x83a   :  { %v1288_v21 = vadd.f32 %v1287_v20, %v1286_v38  ;;  %v1289_v22 = vpop.f32.mrb[14].mxu1 }
 0x83b   :  { %v1290_v23 = vpop.f32.mrb[15].mxu1 }
 0x83c   :  { %v1037_v24 = vadd.f32 %v1288_v21, %v1953_v11  ;;  %v1291_v25 = vadd.f32 %v1290_v23, %v1289_v22 }
 0x83e   :  { %v1038_v26 = vadd.f32 %v1291_v25, %v1956_v12  ;;  %v1039_v27 = vmul.f32 3.0, %v1037_v24 }
 0x840   :  { %v1040_v29 = vmul.f32 2.0, %v1038_v26 }
 0x842   :  { %v1041_v30 = vsub.f32 %v1039_v27, %v1040_v29 }
 0x844   :  { %v1042_v31 = vpack.c.bf16 %v1041_v30, %v1041_v30 }
 0x846   :  { %1376 = vmatmul.mubr.bf16.vlgmr.msra.gmra.mrb[16].mxu0 %v1042_v31 }
 0x919   :  { %v1141_v32 = vpop.f32.mrb[16].mxu0 }
 0x91a   :  { %v1149_v33 = vmul.f32 %v1148_v0, %v1141_v32  ;;  %v1377_v34 = vpop.f32.mrb[17].mxu0 }
 0x91b   :  { %v1144_v35 = vpop.f32.mrb[18].mxu0 }
 0x91c   :  { %v1150_v11 = vadd.f32 %v1149_v33, %v1864_v2  ;;  %v1378_v36 = vpop.f32.mrb[19].mxu0 }
 0x91e   :  { %1151 = vst.msk [vmem:[#allocation14] sm:$0xff] %vm140_vm1, %v1150_v11 }
 0x91f   :  { %1643 = shalt.err (!%p1640_p10)
}
 0x920   :  { %s1644_s8 = scalar_lea.hbm %s2025_s13, 128 }
 0x921   :  { %p1645_p11 = scmp.ne.s32.totalorder %s2025_s13, %s1644_s8  ;;  %p1648_p12 = scmp.lt.u32.totalorder %s1644_s8, %s2025_s13 }
 0x923   :  { %p1650_p13 = pnand %p1648_p12, %p1645_p11 }
 0x925   :  { %1653 = shalt.err (!%p1650_p13)
}
 0x926   :  { %1161 = dma.vmem_to_hbm [thread:$0]  %s1159_s30, 128, %s2025_s13, [#allocation5]  }
 0x927   :  { %1662 = dma.done.wait [#allocation5], 128  }
 0x928   :  { %1663 = vsyncadd [#allocation5], 4294967168 }
 0x929   :  { %1165 = vsyncpa [#allocation4], 1 }
 0x92a   :  { %1166 = vsyncpa [#allocation7], 1 }
 0x92b   :  { %1167 = vsyncpa [#allocation10], 1 }
 0x92c   :  { %1168 = vsyncpa [#allocation13], 1 }
 0x92d   :  { %1169 = vsyncpa [#allocation5], 1 }

</bundles_post_ra>
